<compile_context>
chip_gen: v7x
topology: tpu7x:2x2x1
jax: 0.10.0
libtpu: 0.0.40
codegen_flags: <defaults>
</compile_context>

<pallas_src>
import functools

import jax
import jax.numpy as jnp
from jax.experimental import pallas as pl
from jax.experimental.pallas import tpu as pltpu


# ---------------------------------------------------------------------------
# Helpers
# ---------------------------------------------------------------------------
def _pick_spatial_tile(s, max_tile=8192):
    """Largest multiple of 128 that divides s (capped at max_tile); else s."""
    if s % 128 != 0:
        return s  # full-extent block (allowed since it equals the array dim)
    t = min(s, max_tile)
    t -= t % 128
    while t > 0 and s % t != 0:
        t -= 128
    return t if t > 0 else s


def _conv1x1_logits(x, w, b):
    """x: (Cin, T) f32, w: (Cout, Cin) f32, b: (Cout, 1) f32 -> (Cout, T) f32.

    Unrolled VPU broadcast-multiply-add over Cin (K is tiny; MXU would be
    pure push/pop overhead).  Everything stays in lane-dense vregs.
    """
    cin = x.shape[0]
    logits = b + w[:, 0:1] * x[0:1, :]
    for ci in range(1, cin):
        logits = logits + w[:, ci:ci + 1] * x[ci:ci + 1, :]
    return logits


# ---------------------------------------------------------------------------
# Kernels
# ---------------------------------------------------------------------------
def _conv1x1_kernel(x_ref, w_ref, b_ref, o_ref):
    # x_ref: (Cin, T), w_ref: (Cout, Cin), b_ref: (Cout, 1), o_ref: (Cout, T)
    logits = _conv1x1_logits(x_ref[...].astype(jnp.float32),
                             w_ref[...].astype(jnp.float32),
                             b_ref[...].astype(jnp.float32))
    o_ref[...] = logits.astype(o_ref.dtype)


def _conv1x1_bce_kernel(x_ref, w_ref, b_ref, t_ref, o_ref, loss_ref, acc_ref,
                        *, inv_total):
    # Fused: 1x1 conv + numerically-stable BCEWithLogits, accumulated across
    # the whole grid into an SMEM scalar and normalized by the global count.
    logits = _conv1x1_logits(x_ref[...].astype(jnp.float32),
                             w_ref[...].astype(jnp.float32),
                             b_ref[...].astype(jnp.float32))
    o_ref[...] = logits.astype(o_ref.dtype)

    t = t_ref[...].astype(jnp.float32)
    # BCEWithLogits (stable form): max(x,0) - x*t + log(1 + exp(-|x|))
    per_elem = (jnp.maximum(logits, 0.0)
                - logits * t
                + jnp.log1p(jnp.exp(-jnp.abs(logits))))
    tile_sum = jnp.sum(per_elem)

    i = pl.program_id(0)
    j = pl.program_id(1)
    is_first = jnp.logical_and(i == 0, j == 0)
    is_last = jnp.logical_and(i == pl.num_programs(0) - 1,
                              j == pl.num_programs(1) - 1)

    @pl.when(is_first)
    def _():
        acc_ref[0] = jnp.float32(0.0)

    acc_ref[0] = acc_ref[0] + tile_sum

    @pl.when(is_last)
    def _():
        loss_ref[0, 0] = acc_ref[0] * inv_total


# ---------------------------------------------------------------------------
# Wrapper
# ---------------------------------------------------------------------------
def unet_mask_forward(x_nchw, weight, bias, target_masks=None, *,
                      max_tile_s=8192):
    """Forward pass of UnetMask.

    Args:
      x_nchw:       (N, Cin, H, W) float32   (PyTorch NCHW convention)
      weight:       (Cout, Cin, 1, 1) float32 (PyTorch Conv2d weight)
      bias:         (Cout,) float32
      target_masks: optional (N, Cout, H, W) float32

    Returns:
      logits (N, Cout, H, W)                        if target_masks is None
      (logits (N, Cout, H, W), {'loss_mask': ()})   otherwise
    """
    N, Cin, H, W = x_nchw.shape
    Cout = weight.shape[0]
    S = H * W
    tile_s = _pick_spatial_tile(S, max_tile_s)
    n_s_tiles = S // tile_s
    grid = (N, n_s_tiles)

    # Free reshapes only — no transposes, native NCHW layout.
    x3 = x_nchw.reshape(N, Cin, S)
    w_mat = weight.reshape(Cout, Cin)
    b_col = bias.reshape(Cout, 1)

    x_spec = pl.BlockSpec((None, Cin, tile_s), lambda i, j: (i, 0, j))
    w_spec = pl.BlockSpec((Cout, Cin), lambda i, j: (0, 0))
    b_spec = pl.BlockSpec((Cout, 1), lambda i, j: (0, 0))
    o_spec = pl.BlockSpec((None, Cout, tile_s), lambda i, j: (i, 0, j))

    if target_masks is None:
        out = pl.pallas_call(
            _conv1x1_kernel,
            out_shape=jax.ShapeDtypeStruct((N, Cout, S), jnp.float32),
            grid=grid,
            in_specs=[x_spec, w_spec, b_spec],
            out_specs=o_spec,
            compiler_params=pltpu.CompilerParams(
                dimension_semantics=("parallel", "parallel")),
        )(x3, w_mat, b_col)
        return out.reshape(N, Cout, H, W)

    t3 = target_masks.reshape(N, Cout, S)
    t_spec = pl.BlockSpec((None, Cout, tile_s), lambda i, j: (i, 0, j))
    loss_spec = pl.BlockSpec((1, 1), lambda i, j: (0, 0),
                             memory_space=pltpu.MemorySpace.SMEM)

    kernel = functools.partial(_conv1x1_bce_kernel,
                               inv_total=1.0 / float(N * Cout * S))
    out, loss = pl.pallas_call(
        kernel,
        out_shape=(
            jax.ShapeDtypeStruct((N, Cout, S), jnp.float32),
            jax.ShapeDtypeStruct((1, 1), jnp.float32),
        ),
        grid=grid,
        in_specs=[x_spec, w_spec, b_spec, t_spec],
        out_specs=(o_spec, loss_spec),
        scratch_shapes=[pltpu.SMEM((1,), jnp.float32)],
        compiler_params=pltpu.CompilerParams(
            # The scalar loss accumulator carries state across both axes.
            dimension_semantics=("arbitrary", "arbitrary")),
    )(x3, w_mat, b_col, t3)

    logits_nchw = out.reshape(N, Cout, H, W)
    losses = {"loss_mask": loss[0, 0]}
    return logits_nchw, losses


# ---------------------------------------------------------------------------
# Main
# ---------------------------------------------------------------------------
if __name__ == "__main__":
    key = jax.random.PRNGKey(0)
    k_x, k_w, k_b, k_t = jax.random.split(key, 4)

    N, Cin, Cout, Hh, Ww = 2, 4, 8, 16, 16

    x = jax.random.normal(k_x, (N, Cin, Hh, Ww), dtype=jnp.float32)
    # Deterministic "Conv2d(Cin, Cout, 1)" parameters (uniform, kaiming-ish bound)
    bound = 1.0 / (Cin ** 0.5)
    weight = jax.random.uniform(k_w, (Cout, Cin, 1, 1), jnp.float32, -bound, bound)
    bias = jax.random.uniform(k_b, (Cout,), jnp.float32, -bound, bound)
    # Targets in [0, 1] like mask labels
    target = jax.random.uniform(k_t, (N, Cout, Hh, Ww), jnp.float32, 0.0, 1.0)

    fwd = jax.jit(unet_mask_forward)

    # Inference path (target_masks=None)
    logits_only = fwd(x, weight, bias, None)
    jax.block_until_ready(logits_only)

    # Training path (with target masks -> BCEWithLogits loss)
    logits, losses = fwd(x, weight, bias, target)
    jax.block_until_ready((logits, losses))

    # Sanity check against a pure-JAX reference.
    ref_logits = (
        jnp.einsum("nchw,oc->nohw", x, weight.reshape(Cout, Cin)) +
        bias.reshape(1, Cout, 1, 1)
    )
    per = (jnp.maximum(ref_logits, 0.0) - ref_logits * target +
           jnp.log1p(jnp.exp(-jnp.abs(ref_logits))))
    ref_loss = jnp.mean(per)

    assert logits_only.shape == (N, Cout, Hh, Ww)
    assert logits.shape == (N, Cout, Hh, Ww)
    assert jnp.allclose(logits_only, ref_logits, atol=1e-4, rtol=1e-4)
    assert jnp.allclose(logits, ref_logits, atol=1e-4, rtol=1e-4)
    assert jnp.allclose(losses["loss_mask"], ref_loss, atol=1e-5, rtol=1e-5)

    print("KERNEL_OK")
</pallas_src>

<mosaic_0001>
module attributes {stable_mosaic.version = 11 : i64} {
  func.func @_conv1x1_kernel(%arg0: i32, %arg1: i32, %arg2: memref<1x4x256xf32, #tpu.memory_space<vmem>>, %arg3: memref<8x4xf32, #tpu.memory_space<vmem>>, %arg4: memref<8x1xf32, #tpu.memory_space<vmem>>, %arg5: memref<1x8x256xf32, #tpu.memory_space<vmem>>) attributes {dimension_semantics = [#tpu.dimension_semantics<parallel>, #tpu.dimension_semantics<parallel>], iteration_bounds = array<i64: 2, 1>, scalar_prefetch = 0 : i64, scratch_operands = 0 : i64, tpu.core_type = #tpu.core_type<tc>, window_params = [{transform_indices = @transform_0, window_bounds = array<i64: 1, 4, 256>}, {pipeline_mode = #tpu.pipeline_mode<synchronous>, transform_indices = @transform_1, window_bounds = array<i64: 8, 4>}, {pipeline_mode = #tpu.pipeline_mode<synchronous>, transform_indices = @transform_2, window_bounds = array<i64: 8, 1>}, {transform_indices = @transform_3, window_bounds = array<i64: 1, 8, 256>}]} {
    %c0 = arith.constant 0 : index
    %c0_0 = arith.constant 0 : index
    %c0_1 = arith.constant 0 : index
    %0 = vector.load %arg2[%c0, %c0_0, %c0_1] : memref<1x4x256xf32, #tpu.memory_space<vmem>>, vector<1x4x256xf32>
    %1 = vector.shape_cast %0 : vector<1x4x256xf32> to vector<4x256xf32>
    %c0_2 = arith.constant 0 : index
    %c0_3 = arith.constant 0 : index
    %2 = vector.load %arg3[%c0_2, %c0_3] : memref<8x4xf32, #tpu.memory_space<vmem>>, vector<8x4xf32>
    %c0_4 = arith.constant 0 : index
    %c0_5 = arith.constant 0 : index
    %3 = vector.load %arg4[%c0_4, %c0_5] : memref<8x1xf32, #tpu.memory_space<vmem>>, vector<8x1xf32>
    %4 = vector.extract_strided_slice %2 {offsets = [0, 0], sizes = [8, 1], strides = [1, 1]} : vector<8x4xf32> to vector<8x1xf32>
    %5 = vector.extract_strided_slice %1 {offsets = [0, 0], sizes = [1, 256], strides = [1, 1]} : vector<4x256xf32> to vector<1x256xf32>
    %6 = vector.broadcast %4 : vector<8x1xf32> to vector<8x256xf32>
    %7 = vector.broadcast %5 : vector<1x256xf32> to vector<8x256xf32>
    %8 = arith.mulf %6, %7 : vector<8x256xf32>
    %9 = vector.broadcast %3 : vector<8x1xf32> to vector<8x256xf32>
    %10 = arith.addf %9, %8 : vector<8x256xf32>
    %11 = vector.extract_strided_slice %2 {offsets = [0, 1], sizes = [8, 1], strides = [1, 1]} : vector<8x4xf32> to vector<8x1xf32>
    %12 = vector.extract_strided_slice %1 {offsets = [1, 0], sizes = [1, 256], strides = [1, 1]} : vector<4x256xf32> to vector<1x256xf32>
    %13 = vector.broadcast %11 : vector<8x1xf32> to vector<8x256xf32>
    %14 = vector.broadcast %12 : vector<1x256xf32> to vector<8x256xf32>
    %15 = arith.mulf %13, %14 : vector<8x256xf32>
    %16 = arith.addf %10, %15 : vector<8x256xf32>
    %17 = vector.extract_strided_slice %2 {offsets = [0, 2], sizes = [8, 1], strides = [1, 1]} : vector<8x4xf32> to vector<8x1xf32>
    %18 = vector.extract_strided_slice %1 {offsets = [2, 0], sizes = [1, 256], strides = [1, 1]} : vector<4x256xf32> to vector<1x256xf32>
    %19 = vector.broadcast %17 : vector<8x1xf32> to vector<8x256xf32>
    %20 = vector.broadcast %18 : vector<1x256xf32> to vector<8x256xf32>
    %21 = arith.mulf %19, %20 : vector<8x256xf32>
    %22 = arith.addf %16, %21 : vector<8x256xf32>
    %23 = vector.extract_strided_slice %2 {offsets = [0, 3], sizes = [8, 1], strides = [1, 1]} : vector<8x4xf32> to vector<8x1xf32>
    %24 = vector.extract_strided_slice %1 {offsets = [3, 0], sizes = [1, 256], strides = [1, 1]} : vector<4x256xf32> to vector<1x256xf32>
    %25 = vector.broadcast %23 : vector<8x1xf32> to vector<8x256xf32>
    %26 = vector.broadcast %24 : vector<1x256xf32> to vector<8x256xf32>
    %27 = arith.mulf %25, %26 : vector<8x256xf32>
    %28 = arith.addf %22, %27 : vector<8x256xf32>
    %c0_6 = arith.constant 0 : index
    %c0_7 = arith.constant 0 : index
    %c0_8 = arith.constant 0 : index
    %29 = vector.load %arg5[%c0_6, %c0_7, %c0_8] : memref<1x8x256xf32, #tpu.memory_space<vmem>>, vector<1x8x256xf32>
    %30 = vector.shape_cast %29 : vector<1x8x256xf32> to vector<8x256xf32>
    %31 = vector.shape_cast %28 : vector<8x256xf32> to vector<1x8x256xf32>
    tpu.vector_store %arg5[%c0_6, %c0_7, %c0_8], %31 {strides = array<i32>} : memref<1x8x256xf32, #tpu.memory_space<vmem>>, vector<1x8x256xf32>,
    return
  }
  func.func @transform_0(%arg0: i32, %arg1: i32) -> (i32, i32, i32) {
    %c0_i32 = arith.constant 0 : i32
    %c0_i32_0 = arith.constant 0 : i32
    return %arg0, %c0_i32, %arg1 : i32, i32, i32
  }
  func.func @transform_1(%arg0: i32, %arg1: i32) -> (i32, i32) {
    %c0_i32 = arith.constant 0 : i32
    %c0_i32_0 = arith.constant 0 : i32
    %c0_i32_1 = arith.constant 0 : i32
    return %c0_i32, %c0_i32_0 : i32, i32
  }
  func.func @transform_2(%arg0: i32, %arg1: i32) -> (i32, i32) {
    %c0_i32 = arith.constant 0 : i32
    %c0_i32_0 = arith.constant 0 : i32
    %c0_i32_1 = arith.constant 0 : i32
    return %c0_i32, %c0_i32_0 : i32, i32
  }
  func.func @transform_3(%arg0: i32, %arg1: i32) -> (i32, i32, i32) {
    %c0_i32 = arith.constant 0 : i32
    %c0_i32_0 = arith.constant 0 : i32
    return %arg0, %c0_i32, %arg1 : i32, i32, i32
  }
}

</mosaic_0001>

<bundles_post_ra>
// kernel: unet_mask_forward.1
= control target key start
LH: loop header
LB: loop body
LE: loop exit
PB: predicated region body
PF: predicated region fallthrough
CT: control target
= control target key end

     0   :  { %s506_s12 = smov 0   ;;  %s508_s13 = smov 0   ;;  %s549_s0 = inlined_call_operand.vmem [shape: f32[2,4,256], index: 0, kind: input, shape index: {}]   ;;  %s550_s1 = inlined_call_operand.vmem [shape: f32[8,4], index: 1, kind: input, shape index: {}]   ;;  %s551_s2 = inlined_call_operand.vmem [shape: f32[8,1], index: 2, kind: input, shape index: {}]   ;;  %s552_s3 = inlined_call_operand.vmem [shape: f32[2,8,256], index: 3, kind: output, shape index: {}]  }
   0x1   :  { %s510_s14 = smov 0  }
   0x2 LB: > { %s25_s15 = sadd.s32 1, %s476_s13  ;;  %p417_p0 = scmp.ge.s32.totalorder %s480_s14, 1  ;;  %s480_s14 = sphi %s510_s14, %s13_s14   ;;  %s476_s13 = sphi %s508_s13, %s554_s13   ;;  %s472_s12 = sphi %s506_s12, %s553_s12  }
   0x3   : > { %p27_p1 = scmp.ge.s32.totalorder %s25_s15, 2  ;;  %p158_p2 = scmp.lt.s32.totalorder %s480_s14, 3 }
   0x5   : > { %s556_s15 = smov (%p27_p1, %s25_s15), 0  ;;  %p159_p3 = pnand %p417_p0, %p158_p2 }
   0x6   : > { %v211_v0 = vld [vmem:[%s550_s1] sm:$0xff] (!%p159_p3)  ;;  %v482_v1 = vmov (!%p159_p3), 0   ;;  %v483_v2 = vmov (!%p159_p3), 1   ;;  %v484_v4 = vmov (!%p159_p3), 2   ;;  %v485_v5 = vmov (!%p159_p3), 3   ;;  %p191_p4 = scmp.lt.s32.totalorder (!%p159_p3), %s472_s12, 1 }
   0x7   : > { %162 = sbr.rel (%p159_p3) target bundleno = 150 (0x96), region = 32  ;;  %454 = vset.pattern.permute.xlu0 (!%p159_p3), %v482_v1  ;;  %455 = vset.pattern.permute.xlu1 (!%p159_p3), %v483_v2  ;;  %v212_v3 = vld [vmem:[%s551_s2] sm:$0xff] (!%p159_p3)  ;;  %v219_v6 = vlaneseq (!%p159_p3) }
   0x8   : > { %215 = vperm.xlu0 (!%p159_p3), %454, %v211_v0   ;;  %247 = vperm.xlu1 (!%p159_p3), %455, %v211_v0  }
   0x9   : > { %v220_v7 = vshrl.u32 (!%p159_p3), %v219_v6, 7 }
   0xb   : > { %v221_v8 = vsub.s32 (!%p159_p3), 0, %v220_v7  ;;  %v225_v9 = vsub.s32 (!%p159_p3), 4, %v220_v7  ;;  %v252_v11 = vsub.s32 (!%p159_p3), 1, %v220_v7  ;;  %v256_v12 = vsub.s32 (!%p159_p3), 5, %v220_v7 }
   0xc   : > { %241 = vperm.xlu0 (!%p159_p3), %454, %v212_v3   ;;  %456 = vset.pattern.permute.xlu1 (!%p159_p3), %v484_v4  ;;  %v278_v13 = vsub.s32 (!%p159_p3), 2, %v220_v7  ;;  %v282_v14 = vsub.s32 (!%p159_p3), 6, %v220_v7  ;;  %v304_v21 = vsub.s32 (!%p159_p3), 3, %v220_v7  ;;  %v308_v22 = vsub.s32 (!%p159_p3), 7, %v220_v7 }
   0xd   : > { %273 = vperm.xlu1 (!%p159_p3), %456, %v211_v0  }
   0xe   : > { %s558_s12 = smov (!%p191_p4, %s472_s12), 1 }
   0xf   : > { %s424_s20 = sshll.u32 %s558_s12, 3  ;;  %s425_s24 = sshll.u32 %s558_s12, 4 }
  0x10   : > { %457 = vset.pattern.permute.xlu0 %v485_v5  ;;  %s198_s23 = scalar_lea.vmem %s549_s0, %s424_s20  ;;  %s208_s27 = scalar_lea.vmem %s552_s3, %s425_s24 }
  0x11   : > { %299 = vperm.xlu0 %457, %v211_v0   ;;  %v210_v10 = vld [vmem:[%s198_s23] sm:$0xff] }
  0x12   : > { %v222_v15 = vrot.slane %v210_v10, %v221_v8  ;;  %v226_v16 = vrot.slane %v210_v10, %v225_v9  ;;  %v253_v17 = vrot.slane %v210_v10, %v252_v11  ;;  %v257_v18 = vrot.slane %v210_v10, %v256_v12 }
  0x13   : > { %v279_v19 = vrot.slane %v210_v10, %v278_v13  ;;  %v283_v20 = vrot.slane %v210_v10, %v282_v14  ;;  %v305_v31 = vrot.slane %v210_v10, %v304_v21  ;;  %v309_v32 = vrot.slane %v210_v10, %v308_v22 }
  0x14   : > { %v232_v23 = vrot.slane %v222_v15, %v221_v8  ;;  %v236_v24 = vrot.slane %v226_v16, %v221_v8  ;;  %v263_v27 = vrot.slane %v253_v17, %v252_v11  ;;  %v267_v28 = vrot.slane %v257_v18, %v252_v11 }
  0x15   : > { %v289_v29 = vrot.slane %v279_v19, %v278_v13  ;;  %v293_v30 = vrot.slane %v283_v20, %v278_v13  ;;  %v315_v43 = vrot.slane %v305_v31, %v304_v21  ;;  %v319_v44 = vrot.slane %v309_v32, %v304_v21 }
  0x87   : > { %v216_v25 = vpop.permute.xlu0 %215  ;;  %v248_v26 = vpop.permute.xlu1 %247 }
  0x88   : > { %v237_v33 = vmul.f32 %v232_v23, %v216_v25  ;;  %v238_v34 = vmul.f32 %v236_v24, %v216_v25  ;;  %v268_v36 = vmul.f32 %v263_v27, %v248_v26  ;;  %v269_v37 = vmul.f32 %v267_v28, %v248_v26 }
  0x8b   : > { %v242_v35 = vpop.permute.xlu0 %241 }
  0x8c   : > { %v244_v38 = vadd.f32 %v242_v35, %v237_v33  ;;  %v245_v39 = vadd.f32 %v242_v35, %v238_v34  ;;  %v274_v40 = vpop.permute.xlu1 %273 }
  0x8d   : > { %v294_v41 = vmul.f32 %v289_v29, %v274_v40  ;;  %v295_v42 = vmul.f32 %v293_v30, %v274_v40 }
  0x8e   : > { %v270_v45 = vadd.f32 %v268_v36, %v244_v38  ;;  %v271_v46 = vadd.f32 %v269_v37, %v245_v39 }
  0x90   : > { %v296_v47 = vadd.f32 %v294_v41, %v270_v45  ;;  %v297_v48 = vadd.f32 %v295_v42, %v271_v46  ;;  %v300_v49 = vpop.permute.xlu0 %299 }
  0x91   : > { %v320_v50 = vmul.f32 %v315_v43, %v300_v49  ;;  %v321_v51 = vmul.f32 %v319_v44, %v300_v49 }
  0x93   : > { %v322_v52 = vadd.f32 %v320_v50, %v296_v47  ;;  %v323_v53 = vadd.f32 %v321_v51, %v297_v48 }
  0x95   : > { %324 = vst [vmem:[%s208_s27] sm:$0xff] %v322_v52  ;;  %325 = vst [vmem:[%s208_s27 + $0x8] sm:$0xff] %v323_v53 }
  0x96 PF: > { %s13_s14 = sadd.s32 1, %s480_s14   ;;  %s553_s12 = smov %s476_s13 }
  0x97   : > { %p10_p5 = scmp.ge.s32.totalorder %s13_s14, 4   ;;  %s554_s13 = smov %s556_s15 }
  0x99   :  { %12 = sbr.rel (!%p10_p5) target bundleno = 2 (0x2), region = 62 }

</bundles_post_ra>
